<compile_context>
chip_gen: v6e
topology: v6e:2x2x1
jax: 0.10.0
libtpu: 0.0.40
codegen_flags: <defaults>
</compile_context>

<pallas_src>
import functools

import jax
import jax.numpy as jnp
from jax.experimental import pallas as pl
from jax.experimental.pallas import tpu as pltpu


def _round_up(a, b):
    return (a + b - 1) // b * b


def _cdiv(a, b):
    return -(-a // b)


def _vmem_capacity_bytes():
    try:
        info = pltpu.get_tpu_info()
        cap = getattr(info, "vmem_capacity_bytes", None)
        if cap:
            return int(cap)
    except Exception:
        pass
    return 64 * 1024 * 1024  # conservative default: v7x per-TensorCore VMEM


def _pick_row_tile(R, budget_rows, target_steps=4):
    """Row tile: either full R (legal via the full-dim exception) or a multiple
    of 8, within budget_rows, aiming for >= target_steps grid steps so every
    TensorCore keeps a double-buffered pipeline."""
    if R <= 8:
        return R
    if R < target_steps * 8 and budget_rows >= R:
        return R  # small row count: one exact block, no out-of-bounds rows
    tile = max(8, (min(budget_rows, R) // 8) * 8)
    if R >= target_steps * 8:
        tile = min(tile, max(8, ((R // target_steps) // 8) * 8))
    return tile


def _vmem_limit(est_bytes, vmem_cap):
    """Scoped VMEM limit from actual accounting, with headroom for compiler
    temporaries, never above ~95% of physical VMEM."""
    return int(min(int(vmem_cap * 0.95), max(est_bytes + (12 << 20), 32 << 20)))


def _per_row_params(col_f32, N, C, rows_needed):
    """(C,) -> (rows_needed, 1) f32 per-row params (tiny; padding is free)."""
    rows = jnp.broadcast_to(col_f32.reshape(1, C), (N, C)).reshape(N * C, 1)
    if rows_needed > N * C:
        rows = jnp.pad(rows, ((0, rows_needed - N * C), (0, 0)))
    return rows


# ----------------------------------------------------------------------------
# Kernels
# ----------------------------------------------------------------------------

def _fused_kernel(x_ref, w_ref, b_ref, o_ref, *, eps, hw):
    """One (tile_rows, hw) block: two-pass stats + normalize + affine, f32 math."""
    x = x_ref[...].astype(jnp.float32)                       # (rows, hw)
    mean = jnp.sum(x, axis=-1, keepdims=True) * (1.0 / hw)   # (rows, 1)
    d = x - mean
    # torch.var default: unbiased (Bessel) -> divide by (H*W - 1).
    var = jnp.sum(d * d, axis=-1, keepdims=True) * (1.0 / max(hw - 1, 1))
    inv_std = jax.lax.rsqrt(var + eps)
    scale = w_ref[...].astype(jnp.float32) * inv_std          # (rows, 1)
    o_ref[...] = (d * scale + b_ref[...].astype(jnp.float32)).astype(o_ref.dtype)


def _stats_kernel(x_ref, w_ref, b_ref, scale_ref, shift_ref, *,
                  eps, hw, tile_hw, need_mask):
    """Accumulate sum / sum(x^2) over the hw-chunk ('arbitrary') axis into the
    resident (rows, 1) output blocks; on the last chunk fold the epilogue and
    overwrite them with per-row scale / shift."""
    j = pl.program_id(1)

    @pl.when(j == 0)
    def _():
        scale_ref[...] = jnp.zeros_like(scale_ref)   # running sum
        shift_ref[...] = jnp.zeros_like(shift_ref)   # running sum of squares

    x = x_ref[...].astype(jnp.float32)
    if need_mask:
        # Ragged lane edge handled in-kernel (no wrapper-side padding of x).
        col0 = j * tile_hw
        lane = jax.lax.broadcasted_iota(jnp.int32, (1, tile_hw), 1)
        x = jnp.where(lane < (hw - col0), x, 0.0)

    scale_ref[...] += jnp.sum(x, axis=-1, keepdims=True)
    shift_ref[...] += jnp.sum(x * x, axis=-1, keepdims=True)

    @pl.when(j == pl.num_programs(1) - 1)
    def _():
        s = scale_ref[...]
        sq = shift_ref[...]
        mean = s * (1.0 / hw)
        var = jnp.maximum(sq - s * mean, 0.0) * (1.0 / max(hw - 1, 1))
        inv_std = jax.lax.rsqrt(var + eps)
        scale = w_ref[...].astype(jnp.float32) * inv_std
        scale_ref[...] = scale
        shift_ref[...] = b_ref[...].astype(jnp.float32) - mean * scale


def _apply_kernel(x_ref, scale_ref, shift_ref, o_ref):
    """y = x * scale + shift (per-row scale/shift), f32 math, cast at store."""
    o_ref[...] = (x_ref[...].astype(jnp.float32) * scale_ref[...]
                  + shift_ref[...]).astype(o_ref.dtype)


# ----------------------------------------------------------------------------
# Wrapper
# ----------------------------------------------------------------------------

def instance_norm_2d(x, weight, bias, eps=1e-5, *, vmem_budget_bytes=None):
    """x: (N, C, H, W); weight/bias: (C, 1, 1) -> (N, C, H, W)."""
    N, C, H, W = x.shape
    R = N * C
    hw = H * W
    out_dtype = x.dtype
    in_el = jnp.dtype(out_dtype).itemsize  # true bytes/elem for DMA'd blocks

    vmem_cap = _vmem_capacity_bytes()
    budget = int(vmem_budget_bytes) if vmem_budget_bytes is not None \
        else int(vmem_cap * 0.8)

    # No padding / extra HBM pass over x: reshape is layout metadata only.
    x2d = x.reshape(R, hw)
    w_col = weight.reshape(C).astype(jnp.float32)
    b_col = bias.reshape(C).astype(jnp.float32)
    eps_f = float(eps)

    # Fused-path footprint per row of hw elements:
    #   2x input block + 2x output block (double-buffered, native dtype)
    #   + ~2 full-tile f32 temporaries (upcast copy / centered values).
    fused_row_bytes = hw * (4 * in_el + 8)
    rows_min = min(R, 8)
    fused_ok = budget // max(fused_row_bytes, 1) >= rows_min

    if fused_ok:
        tile_rows = _pick_row_tile(R, budget // fused_row_bytes)
        grid_rows = _cdiv(R, tile_rows)
        rows_cov = grid_rows * tile_rows
        w_rows = _per_row_params(w_col, N, C, rows_cov)
        b_rows = _per_row_params(b_col, N, C, rows_cov)
        vmem_limit = _vmem_limit(tile_rows * fused_row_bytes, vmem_cap)

        out2d = pl.pallas_call(
            functools.partial(_fused_kernel, eps=eps_f, hw=hw),
            out_shape=jax.ShapeDtypeStruct((R, hw), out_dtype),
            grid_spec=pltpu.PrefetchScalarGridSpec(
                num_scalar_prefetch=0,
                grid=(grid_rows,),
                in_specs=[
                    # Lane dim = full hw (full-dim exception; no 128-padding).
                    pl.BlockSpec((tile_rows, hw), lambda i: (i, 0)),
                    # Per-tile param blocks (tiny DMA, no resident lane-padded copy).
                    pl.BlockSpec((tile_rows, 1), lambda i: (i, 0)),
                    pl.BlockSpec((tile_rows, 1), lambda i: (i, 0)),
                ],
                out_specs=pl.BlockSpec((tile_rows, hw), lambda i: (i, 0)),
            ),
            compiler_params=pltpu.CompilerParams(
                dimension_semantics=("parallel",),
                vmem_limit_bytes=vmem_limit,
            ),
        )(x2d, w_rows, b_rows)
    else:
        # --- stats + apply split: spatial plane too large for one VMEM block ---
        # stats: 2x in + ~2 f32 temps; apply: 2x in + 2x out + 1 f32 temp.
        split_el_bytes = max(2 * in_el + 8, 4 * in_el + 4)
        tile_hw = min((budget // (rows_min * split_el_bytes)) // 128 * 128,
                      _round_up(hw, 128))
        tile_hw = max(tile_hw, 128)
        tile_rows = _pick_row_tile(R, budget // (tile_hw * split_el_bytes))
        grid_rows = _cdiv(R, tile_rows)
        grid_hw = _cdiv(hw, tile_hw)
        rows_cov = grid_rows * tile_rows
        w_rows = _per_row_params(w_col, N, C, rows_cov)
        b_rows = _per_row_params(b_col, N, C, rows_cov)
        need_mask = (hw % tile_hw) != 0
        vmem_limit = _vmem_limit(tile_rows * tile_hw * split_el_bytes, vmem_cap)

        scale, shift = pl.pallas_call(
            functools.partial(_stats_kernel, eps=eps_f, hw=hw,
                              tile_hw=tile_hw, need_mask=need_mask),
            out_shape=(jax.ShapeDtypeStruct((rows_cov, 1), jnp.float32),
                       jax.ShapeDtypeStruct((rows_cov, 1), jnp.float32)),
            grid_spec=pltpu.PrefetchScalarGridSpec(
                num_scalar_prefetch=0,
                grid=(grid_rows, grid_hw),
                in_specs=[
                    pl.BlockSpec((tile_rows, tile_hw), lambda i, j: (i, j)),
                    pl.BlockSpec((tile_rows, 1), lambda i, j: (i, 0)),
                    pl.BlockSpec((tile_rows, 1), lambda i, j: (i, 0)),
                ],
                out_specs=(pl.BlockSpec((tile_rows, 1), lambda i, j: (i, 0)),
                           pl.BlockSpec((tile_rows, 1), lambda i, j: (i, 0))),
            ),
            compiler_params=pltpu.CompilerParams(
                dimension_semantics=("parallel", "arbitrary"),
                vmem_limit_bytes=vmem_limit,
            ),
        )(x2d, w_rows, b_rows)

        out2d = pl.pallas_call(
            _apply_kernel,
            out_shape=jax.ShapeDtypeStruct((R, hw), out_dtype),
            grid_spec=pltpu.PrefetchScalarGridSpec(
                num_scalar_prefetch=0,
                grid=(grid_rows, grid_hw),
                in_specs=[
                    pl.BlockSpec((tile_rows, tile_hw), lambda i, j: (i, j)),
                    pl.BlockSpec((tile_rows, 1), lambda i, j: (i, 0)),
                    pl.BlockSpec((tile_rows, 1), lambda i, j: (i, 0)),
                ],
                out_specs=pl.BlockSpec((tile_rows, tile_hw), lambda i, j: (i, j)),
            ),
            compiler_params=pltpu.CompilerParams(
                dimension_semantics=("parallel", "parallel"),
                vmem_limit_bytes=vmem_limit,
            ),
        )(x2d, scale, shift)

    return out2d.reshape(N, C, H, W)


def instance_norm_2d_ref(x, weight, bias, eps=1e-5):
    """Pure-JAX reference mirroring the PyTorch module (unbiased variance)."""
    mean = jnp.mean(x, axis=(2, 3), keepdims=True)
    n = x.shape[2] * x.shape[3]
    var = jnp.sum((x - mean) ** 2, axis=(2, 3), keepdims=True) / max(n - 1, 1)
    x_norm = (x - mean) / jnp.sqrt(var + eps)
    return weight[None] * x_norm + bias[None]


if __name__ == "__main__":
    key = jax.random.PRNGKey(0)
    N, C, H, W = 2, 4, 16, 16

    x = jax.random.normal(key, (N, C, H, W), dtype=jnp.float32)

    # Deterministic params matching the module's init (perturbed so the affine
    # path is actually exercised).
    weight = jnp.ones((C, 1, 1), dtype=jnp.float32) \
        + 0.1 * jnp.arange(C, dtype=jnp.float32).reshape(C, 1, 1)
    bias = jnp.zeros((C, 1, 1), dtype=jnp.float32) \
        + 0.01 * jnp.arange(C, dtype=jnp.float32).reshape(C, 1, 1)

    ref = instance_norm_2d_ref(x, weight, bias)

    # Default path (fused single-pass kernel at this shape).
    out = jax.block_until_ready(instance_norm_2d(x, weight, bias))
    assert out.shape == (N, C, H, W)
    assert jnp.allclose(out, ref, atol=1e-4, rtol=1e-4), "fused path mismatch"

    # Exercise the large-plane (stats + apply) split path by shrinking the
    # VMEM budget.
    out_split = jax.block_until_ready(
        instance_norm_2d(x, weight, bias, vmem_budget_bytes=4096))
    assert jnp.allclose(out_split, ref, atol=1e-4, rtol=1e-4), "split path mismatch"

    # Non-128-aligned spatial shape (7x7): pad-free fused path via the
    # full-dim lane block.
    x7 = jax.random.normal(jax.random.PRNGKey(1), (N, C, 7, 7), dtype=jnp.float32)
    ref7 = instance_norm_2d_ref(x7, weight, bias)
    out7 = jax.block_until_ready(instance_norm_2d(x7, weight, bias))
    assert jnp.allclose(out7, ref7, atol=1e-4, rtol=1e-4), "ragged fused mismatch"

    # Non-128-aligned spatial shape on the split path: exercises the in-kernel
    # lane mask for the ragged hw edge.
    out7_split = jax.block_until_ready(
        instance_norm_2d(x7, weight, bias, vmem_budget_bytes=4096))
    assert jnp.allclose(out7_split, ref7, atol=1e-4, rtol=1e-4), "ragged split mismatch"

    print("KERNEL_OK")
</pallas_src>

<mosaic_0001>
module attributes {stable_mosaic.version = 11 : i64} {
  func.func @_fused_kernel(%arg0: i32, %arg1: memref<8x256xf32, #tpu.memory_space<vmem>>, %arg2: memref<8x1xf32, #tpu.memory_space<vmem>>, %arg3: memref<8x1xf32, #tpu.memory_space<vmem>>, %arg4: memref<8x256xf32, #tpu.memory_space<vmem>>) attributes {dimension_semantics = [#tpu.dimension_semantics<parallel>], iteration_bounds = array<i64: 1>, scalar_prefetch = 0 : i64, scratch_operands = 0 : i64, tpu.core_type = #tpu.core_type<tc>, window_params = [{transform_indices = @transform_0, window_bounds = array<i64: 8, 256>}, {transform_indices = @transform_1, window_bounds = array<i64: 8, 1>}, {transform_indices = @transform_2, window_bounds = array<i64: 8, 1>}, {transform_indices = @transform_3, window_bounds = array<i64: 8, 256>}]} {
    %c0 = arith.constant 0 : index
    %c0_0 = arith.constant 0 : index
    %0 = vector.load %arg1[%c0, %c0_0] : memref<8x256xf32, #tpu.memory_space<vmem>>, vector<8x256xf32>
    %cst = arith.constant dense<0.000000e+00> : vector<8xf32>
    %1 = vector.multi_reduction <add>, %0, %cst [1] : vector<8x256xf32> to vector<8xf32>
    %2 = vector.shape_cast %1 : vector<8xf32> to vector<8x1xf32>
    %cst_1 = arith.constant 3.906250e-03 : f32
    %3 = vector.broadcast %cst_1 : f32 to vector<8x1xf32>
    %4 = arith.mulf %2, %3 : vector<8x1xf32>
    %5 = vector.broadcast %4 : vector<8x1xf32> to vector<8x256xf32>
    %6 = arith.subf %0, %5 : vector<8x256xf32>
    %7 = arith.mulf %6, %6 : vector<8x256xf32>
    %cst_2 = arith.constant dense<0.000000e+00> : vector<8xf32>
    %8 = vector.multi_reduction <add>, %7, %cst_2 [1] : vector<8x256xf32> to vector<8xf32>
    %9 = vector.shape_cast %8 : vector<8xf32> to vector<8x1xf32>
    %cst_3 = arith.constant 0.00392156886 : f32
    %10 = vector.broadcast %cst_3 : f32 to vector<8x1xf32>
    %11 = arith.mulf %9, %10 : vector<8x1xf32>
    %cst_4 = arith.constant 9.99999974E-6 : f32
    %12 = vector.broadcast %cst_4 : f32 to vector<8x1xf32>
    %13 = arith.addf %11, %12 : vector<8x1xf32>
    %14 = math.rsqrt %13 : vector<8x1xf32>
    %c0_5 = arith.constant 0 : index
    %c0_6 = arith.constant 0 : index
    %15 = vector.load %arg2[%c0_5, %c0_6] : memref<8x1xf32, #tpu.memory_space<vmem>>, vector<8x1xf32>
    %16 = arith.mulf %15, %14 : vector<8x1xf32>
    %17 = vector.broadcast %16 : vector<8x1xf32> to vector<8x256xf32>
    %18 = arith.mulf %6, %17 : vector<8x256xf32>
    %c0_7 = arith.constant 0 : index
    %c0_8 = arith.constant 0 : index
    %19 = vector.load %arg3[%c0_7, %c0_8] : memref<8x1xf32, #tpu.memory_space<vmem>>, vector<8x1xf32>
    %20 = vector.broadcast %19 : vector<8x1xf32> to vector<8x256xf32>
    %21 = arith.addf %18, %20 : vector<8x256xf32>
    %c0_9 = arith.constant 0 : index
    %c0_10 = arith.constant 0 : index
    %22 = vector.load %arg4[%c0_9, %c0_10] : memref<8x256xf32, #tpu.memory_space<vmem>>, vector<8x256xf32>
    tpu.vector_store %arg4[%c0_9, %c0_10], %21 {strides = array<i32>} : memref<8x256xf32, #tpu.memory_space<vmem>>, vector<8x256xf32>,
    return
  }
  func.func @transform_0(%arg0: i32) -> (i32, i32) {
    %c0_i32 = arith.constant 0 : i32
    %c0_i32_0 = arith.constant 0 : i32
    return %arg0, %c0_i32 : i32, i32
  }
  func.func @transform_1(%arg0: i32) -> (i32, i32) {
    %c0_i32 = arith.constant 0 : i32
    %c0_i32_0 = arith.constant 0 : i32
    return %arg0, %c0_i32 : i32, i32
  }
  func.func @transform_2(%arg0: i32) -> (i32, i32) {
    %c0_i32 = arith.constant 0 : i32
    %c0_i32_0 = arith.constant 0 : i32
    return %arg0, %c0_i32 : i32, i32
  }
  func.func @transform_3(%arg0: i32) -> (i32, i32) {
    %c0_i32 = arith.constant 0 : i32
    %c0_i32_0 = arith.constant 0 : i32
    return %arg0, %c0_i32 : i32, i32
  }
}

</mosaic_0001>

<bundles_post_ra>
// kernel: tpu_custom_call.1
= control target key start
LH: loop header
LB: loop body
LE: loop exit
PB: predicated region body
PF: predicated region fallthrough
CT: control target
= control target key end

     0   :  { %s129_s0 = inlined_call_operand.vmem [shape: f32[8,256], index: 0, kind: input, shape index: {}]   ;;  %s130_s1 = inlined_call_operand.vmem [shape: f32[8,1], index: 1, kind: input, shape index: {}]   ;;  %s131_s2 = inlined_call_operand.vmem [shape: f32[8,1], index: 2, kind: input, shape index: {}]   ;;  %s132_s3 = inlined_call_operand.hbm [shape: f32[8,256], index: 3, kind: output, shape index: {}]  }
   0x1   :  { %v15_v0 = vld [vmem:[%s129_s0] sm:$0xff]  ;;  %v16_v1 = vld [vmem:[%s129_s0 + $0x8] sm:$0xff] }
   0x2   :  { %8 = vsyncpa [#allocation3], 0  ;;  %v17_v2 = vadd.f32 %v16_v1, %v15_v0  ;;  %v92_v10 = vmov 0   ;;  %v31_v14 = vld [vmem:[%s130_s1] sm:$0xff]  ;;  %s93_s19 = smov [#allocation2]  }
   0x3   :  { %66 = vset.pattern.permute.xlu1 %v92_v10  ;;  %67 = vset.pattern.permute.xlu0 %v92_v10  ;;  %v40_v17 = vld [vmem:[%s131_s2] sm:$0xff]  ;;  %s56_s20 = sshll.u32 %s93_s19, 4  ;;  %s57_s20 = int_to_ptr.vmem [resolvable:$true] %s56_s20 }
   0x4   :  { %18 = vadd.xlane.f32.xlu0 %v17_v2  ;;  %s70_s1 = scalar_lea.vmem %s57_s20, 256  ;;  %p75_p1 = scmp.lt.s32.totalorder %s57_s20, %s57_s20 }
   0x5   :  { %p71_p0 = scmp.ne.s32.totalorder %s57_s20, %s70_s1  ;;  %p76_p2 = scmp.lt.s32.totalorder %s70_s1, %s70_s1 }
   0x7   :  { %p77_p3 = por %p76_p2, %p75_p1 }
   0x9   :  { %p78_p4 = pnand %p77_p3, %p71_p0 }
  0x8d   :  { %v19_v3 = vpop.xlane.xlu0 %18 }
  0x8e   :  { %v20_v4 = vmul.f32 0.00390625, %v19_v3 }
  0x90   :  { %v21_v5 = vsub.f32 %v15_v0, %v20_v4  ;;  %v22_v6 = vsub.f32 %v16_v1, %v20_v4 }
  0x92   :  { %v23_v7 = vmul.f32 %v21_v5, %v21_v5  ;;  %v24_v8 = vmul.f32 %v22_v6, %v22_v6 }
  0x94   :  { %v25_v9 = vadd.f32 %v24_v8, %v23_v7 }
  0x96   :  { %26 = vadd.xlane.f32.xlu0 %v25_v9 }
 0x11f   :  { %v27_v11 = vpop.xlane.xlu0 %26 }
 0x120   :  { %v28_v12 = vmul.f32 0.003921569, %v27_v11 }
 0x122   :  { %v29_v13 = vadd.f32 1e-05, %v28_v12 }
 0x124   :  { %68 = vrsqrt.f32 %v29_v13 }
 0x131   :  { %v69_v15 = vpop.eup %68 }
 0x132   :  { %v32_v16 = vmul.f32 %v69_v15, %v31_v14 }
 0x134   :  { %35 = vperm.xlu1 %66, %v32_v16  }
 0x138   :  { %43 = vperm.xlu1 %66, %v40_v17  }
 0x1af   :  { %v36_v18 = vpop.permute.xlu1 %35 }
 0x1b0   :  { %v38_v19 = vmul.f32 %v36_v18, %v21_v5  ;;  %v39_v20 = vmul.f32 %v36_v18, %v22_v6 }
 0x1b3   :  { %v44_v21 = vpop.permute.xlu1 %43 }
 0x1b4   :  { %v46_v22 = vadd.f32 %v44_v21, %v38_v19  ;;  %v47_v23 = vadd.f32 %v44_v21, %v39_v20 }
 0x1b6   :  { %48 = vst [vmem:[#allocation2] sm:$0xff] %v46_v22  ;;  %49 = vst [vmem:[#allocation2 + $0x8] sm:$0xff] %v47_v23 }
 0x1b7   :  { %81 = shalt.err (!%p78_p4)
}
 0x1b8   :  { %59 = dma.vmem_to_hbm [thread:$0]  %s57_s20, 256, %s132_s3, [#allocation3]  }
 0x1b9   :  { %90 = dma.done.wait [#allocation3], 256  }
 0x1ba   :  { %91 = vsyncadd [#allocation3], 4294967040 }
 0x1bb   :  { %63 = vsyncpa [#allocation3], 1 }

</bundles_post_ra>
